<compile_context>
chip_gen: v7x
topology: tpu7x:2x2x1
jax: 0.10.0
libtpu: 0.0.40
codegen_flags: <defaults>
</compile_context>

<pallas_src>
import functools

import jax
import jax.numpy as jnp
import numpy as np
from jax.experimental import pallas as pl
from jax.experimental.pallas import tpu as pltpu

LATENT_DIM = 128
# 512-2048 rows reaches ~85% of HBM roofline for streaming kernels while the
# double-buffered bf16 x tile stays ~0.5 MiB (fits v7x's 32 MiB scoped VMEM).
MAX_TILE_ROWS = 1024


def _round_up(x, m):
    return (x + m - 1) // m * m


def _mlp_kernel(x_ref, w1_ref, b1_ref, w2_ref, b2_ref, w3_ref, b3_ref, o_ref):
    # x / weights are bf16 (native MXU input dtype); accumulate in f32,
    # do bias-add + ReLU in f32 (safe on v5e which lacks bf16 VPU),
    # cast the activation back to bf16 before the next matmul.
    x = x_ref[...]
    h1 = jnp.dot(x, w1_ref[...], preferred_element_type=jnp.float32) + b1_ref[...]
    h1 = jnp.maximum(h1, 0.0).astype(jnp.bfloat16)
    h2 = jnp.dot(h1, w2_ref[...], preferred_element_type=jnp.float32) + b2_ref[...]
    h2 = jnp.maximum(h2, 0.0).astype(jnp.bfloat16)
    # *100 is pre-folded into w3 / b3 (prepare_params), no in-kernel multiply.
    out = jnp.dot(h2, w3_ref[...], preferred_element_type=jnp.float32) + b3_ref[...]
    o_ref[...] = out.astype(o_ref.dtype)


def prepare_params(params):
    """One-time parameter transform: fold *100 into fc3, cast weights to bf16."""
    w1, b1, w2, b2, w3, b3 = params
    return (
        w1.astype(jnp.bfloat16), b1.astype(jnp.float32),
        w2.astype(jnp.bfloat16), b2.astype(jnp.float32),
        (w3 * 100.0).astype(jnp.bfloat16), (b3 * 100.0).astype(jnp.float32),
    )


@functools.partial(jax.jit, static_argnames=("tile_rows",))
def position_decoder(state, prepared_params, *, tile_rows=MAX_TILE_ROWS):
    """state: (B, latent_dim) float32 -> (B, 3) float32."""
    w1, b1, w2, b2, w3, b3 = prepared_params
    B, D = state.shape

    # Batch tile: multiple of 8 sublanes, capped at `tile_rows`.
    tb = min(tile_rows, _round_up(B, 8))
    b_pad = _round_up(B, tb)

    x = state.astype(jnp.bfloat16)  # halve HBM streaming of x (dominant traffic)
    if b_pad != B:
        x = jnp.pad(x, ((0, b_pad - B), (0, 0)))

    # Weights / biases: full-shape blocks with constant index maps -> loaded
    # once and kept VMEM-resident across the whole batch grid.
    full = lambda arr: pl.BlockSpec(arr.shape, lambda i: (0,) * arr.ndim)

    out = pl.pallas_call(
        _mlp_kernel,
        out_shape=jax.ShapeDtypeStruct((b_pad, 3), jnp.float32),
        grid=(b_pad // tb,),
        in_specs=[
            pl.BlockSpec((tb, D), lambda i: (i, 0)),  # x streams over batch grid
            full(w1), full(b1), full(w2), full(b2), full(w3), full(b3),
        ],
        # TODO(synk): if masked vst.msk stores ever show as the hot slot, pad
        # fc3 to 128 output lanes and slice [:, :3] here instead.
        out_specs=pl.BlockSpec((tb, 3), lambda i: (i, 0)),
        compiler_params=pltpu.CompilerParams(
            dimension_semantics=("parallel",),  # 2-TC sharding on v7x
        ),
    )(x, w1, b1, w2, b2, w3, b3)
    return out[:B]


def init_params(key, latent_dim=LATENT_DIM):
    """Deterministic f32 init mimicking nn.Linear's uniform(-1/sqrt(fan_in), ...)."""
    dims = [(latent_dim, 64), (64, 32), (32, 3)]
    params = []
    for (fan_in, fan_out) in dims:
        key, kw, kb = jax.random.split(key, 3)
        bound = 1.0 / np.sqrt(fan_in)
        w = jax.random.uniform(kw, (fan_in, fan_out), jnp.float32, -bound, bound)
        b = jax.random.uniform(kb, (1, fan_out), jnp.float32, -bound, bound)
        params += [w, b]
    return tuple(params)


def reference(state, params):
    """Pure-f32 reference matching the PyTorch module exactly."""
    w1, b1, w2, b2, w3, b3 = params
    h1 = jnp.maximum(state @ w1 + b1, 0.0)
    h2 = jnp.maximum(h1 @ w2 + b2, 0.0)
    return (h2 @ w3 + b3) * 100.0


if __name__ == "__main__":
    key = jax.random.PRNGKey(0)
    key, kx = jax.random.split(key)
    latent_dim = LATENT_DIM
    batch = 8
    state = jax.random.normal(kx, (batch, latent_dim), jnp.float32)
    params = init_params(key, latent_dim)
    prepared = prepare_params(params)

    out = position_decoder(state, prepared)
    out = jax.block_until_ready(out)

    ref = reference(state, params)
    # bf16 MXU inputs (f32 accumulation) -> loosened tolerance vs f32 reference.
    np.testing.assert_allclose(np.asarray(out), np.asarray(ref), rtol=2e-2, atol=0.5)
    print("KERNEL_OK")
</pallas_src>

<mosaic_0001>
module attributes {stable_mosaic.version = 11 : i64} {
  func.func @_mlp_kernel(%arg0: i32, %arg1: memref<8x128xbf16, #tpu.memory_space<vmem>>, %arg2: memref<128x64xbf16, #tpu.memory_space<vmem>>, %arg3: memref<1x64xf32, #tpu.memory_space<vmem>>, %arg4: memref<64x32xbf16, #tpu.memory_space<vmem>>, %arg5: memref<1x32xf32, #tpu.memory_space<vmem>>, %arg6: memref<32x3xbf16, #tpu.memory_space<vmem>>, %arg7: memref<1x3xf32, #tpu.memory_space<vmem>>, %arg8: memref<8x3xf32, #tpu.memory_space<vmem>>) attributes {dimension_semantics = [#tpu.dimension_semantics<parallel>], iteration_bounds = array<i64: 1>, scalar_prefetch = 0 : i64, scratch_operands = 0 : i64, tpu.core_type = #tpu.core_type<tc>, window_params = [{transform_indices = @transform_0, window_bounds = array<i64: 8, 128>}, {pipeline_mode = #tpu.pipeline_mode<synchronous>, transform_indices = @transform_1, window_bounds = array<i64: 128, 64>}, {pipeline_mode = #tpu.pipeline_mode<synchronous>, transform_indices = @transform_2, window_bounds = array<i64: 1, 64>}, {pipeline_mode = #tpu.pipeline_mode<synchronous>, transform_indices = @transform_3, window_bounds = array<i64: 64, 32>}, {pipeline_mode = #tpu.pipeline_mode<synchronous>, transform_indices = @transform_4, window_bounds = array<i64: 1, 32>}, {pipeline_mode = #tpu.pipeline_mode<synchronous>, transform_indices = @transform_5, window_bounds = array<i64: 32, 3>}, {pipeline_mode = #tpu.pipeline_mode<synchronous>, transform_indices = @transform_6, window_bounds = array<i64: 1, 3>}, {transform_indices = @transform_7, window_bounds = array<i64: 8, 3>}]} {
    %c0 = arith.constant 0 : index
    %c0_0 = arith.constant 0 : index
    %0 = vector.load %arg1[%c0, %c0_0] : memref<8x128xbf16, #tpu.memory_space<vmem>>, vector<8x128xbf16>
    %c0_1 = arith.constant 0 : index
    %c0_2 = arith.constant 0 : index
    %1 = vector.load %arg2[%c0_1, %c0_2] : memref<128x64xbf16, #tpu.memory_space<vmem>>, vector<128x64xbf16>
    %cst = arith.constant dense<0.000000e+00> : vector<8x64xf32>
    %2 = tpu.matmul %0, %1, %cst {dimension_numbers = #tpu.dot_dimension_numbers<[1], [0], [0], [1], [0, 0, 1, 1], [], []>} : vector<8x128xbf16>, vector<128x64xbf16>, vector<8x64xf32> -> vector<8x64xf32>
    %c0_3 = arith.constant 0 : index
    %c0_4 = arith.constant 0 : index
    %3 = vector.load %arg3[%c0_3, %c0_4] : memref<1x64xf32, #tpu.memory_space<vmem>>, vector<1x64xf32>
    %4 = vector.broadcast %3 : vector<1x64xf32> to vector<8x64xf32>
    %5 = arith.addf %2, %4 : vector<8x64xf32>
    %cst_5 = arith.constant 0.000000e+00 : f32
    %6 = vector.broadcast %cst_5 : f32 to vector<8x64xf32>
    %7 = arith.maximumf %5, %6 : vector<8x64xf32>
    %8 = arith.truncf %7 : vector<8x64xf32> to vector<8x64xbf16>
    %c0_6 = arith.constant 0 : index
    %c0_7 = arith.constant 0 : index
    %9 = vector.load %arg4[%c0_6, %c0_7] : memref<64x32xbf16, #tpu.memory_space<vmem>>, vector<64x32xbf16>
    %cst_8 = arith.constant dense<0.000000e+00> : vector<8x32xf32>
    %10 = tpu.matmul %8, %9, %cst_8 {dimension_numbers = #tpu.dot_dimension_numbers<[1], [0], [0], [1], [0, 0, 1, 1], [], []>} : vector<8x64xbf16>, vector<64x32xbf16>, vector<8x32xf32> -> vector<8x32xf32>
    %c0_9 = arith.constant 0 : index
    %c0_10 = arith.constant 0 : index
    %11 = vector.load %arg5[%c0_9, %c0_10] : memref<1x32xf32, #tpu.memory_space<vmem>>, vector<1x32xf32>
    %12 = vector.broadcast %11 : vector<1x32xf32> to vector<8x32xf32>
    %13 = arith.addf %10, %12 : vector<8x32xf32>
    %cst_11 = arith.constant 0.000000e+00 : f32
    %14 = vector.broadcast %cst_11 : f32 to vector<8x32xf32>
    %15 = arith.maximumf %13, %14 : vector<8x32xf32>
    %16 = arith.truncf %15 : vector<8x32xf32> to vector<8x32xbf16>
    %c0_12 = arith.constant 0 : index
    %c0_13 = arith.constant 0 : index
    %17 = vector.load %arg6[%c0_12, %c0_13] : memref<32x3xbf16, #tpu.memory_space<vmem>>, vector<32x3xbf16>
    %cst_14 = arith.constant dense<0.000000e+00> : vector<8x3xf32>
    %18 = tpu.matmul %16, %17, %cst_14 {dimension_numbers = #tpu.dot_dimension_numbers<[1], [0], [0], [1], [0, 0, 1, 1], [], []>} : vector<8x32xbf16>, vector<32x3xbf16>, vector<8x3xf32> -> vector<8x3xf32>
    %c0_15 = arith.constant 0 : index
    %c0_16 = arith.constant 0 : index
    %19 = vector.load %arg7[%c0_15, %c0_16] : memref<1x3xf32, #tpu.memory_space<vmem>>, vector<1x3xf32>
    %20 = vector.broadcast %19 : vector<1x3xf32> to vector<8x3xf32>
    %21 = arith.addf %18, %20 : vector<8x3xf32>
    %c0_17 = arith.constant 0 : index
    %c0_18 = arith.constant 0 : index
    %22 = vector.load %arg8[%c0_17, %c0_18] : memref<8x3xf32, #tpu.memory_space<vmem>>, vector<8x3xf32>
    tpu.vector_store %arg8[%c0_17, %c0_18], %21 {strides = array<i32>} : memref<8x3xf32, #tpu.memory_space<vmem>>, vector<8x3xf32>,
    return
  }
  func.func @transform_0(%arg0: i32) -> (i32, i32) {
    %c0_i32 = arith.constant 0 : i32
    %c0_i32_0 = arith.constant 0 : i32
    return %arg0, %c0_i32 : i32, i32
  }
  func.func @transform_1(%arg0: i32) -> (i32, i32) {
    %c0_i32 = arith.constant 0 : i32
    %c0_i32_0 = arith.constant 0 : i32
    %c0_i32_1 = arith.constant 0 : i32
    return %c0_i32, %c0_i32_0 : i32, i32
  }
  func.func @transform_2(%arg0: i32) -> (i32, i32) {
    %c0_i32 = arith.constant 0 : i32
    %c0_i32_0 = arith.constant 0 : i32
    %c0_i32_1 = arith.constant 0 : i32
    return %c0_i32, %c0_i32_0 : i32, i32
  }
  func.func @transform_3(%arg0: i32) -> (i32, i32) {
    %c0_i32 = arith.constant 0 : i32
    %c0_i32_0 = arith.constant 0 : i32
    %c0_i32_1 = arith.constant 0 : i32
    return %c0_i32, %c0_i32_0 : i32, i32
  }
  func.func @transform_4(%arg0: i32) -> (i32, i32) {
    %c0_i32 = arith.constant 0 : i32
    %c0_i32_0 = arith.constant 0 : i32
    %c0_i32_1 = arith.constant 0 : i32
    return %c0_i32, %c0_i32_0 : i32, i32
  }
  func.func @transform_5(%arg0: i32) -> (i32, i32) {
    %c0_i32 = arith.constant 0 : i32
    %c0_i32_0 = arith.constant 0 : i32
    %c0_i32_1 = arith.constant 0 : i32
    return %c0_i32, %c0_i32_0 : i32, i32
  }
  func.func @transform_6(%arg0: i32) -> (i32, i32) {
    %c0_i32 = arith.constant 0 : i32
    %c0_i32_0 = arith.constant 0 : i32
    %c0_i32_1 = arith.constant 0 : i32
    return %c0_i32, %c0_i32_0 : i32, i32
  }
  func.func @transform_7(%arg0: i32) -> (i32, i32) {
    %c0_i32 = arith.constant 0 : i32
    %c0_i32_0 = arith.constant 0 : i32
    return %arg0, %c0_i32 : i32, i32
  }
}

</mosaic_0001>

<bundles_post_ra>
// kernel: position_decoder.1
= control target key start
LH: loop header
LB: loop body
LE: loop exit
PB: predicated region body
PF: predicated region fallthrough
CT: control target
= control target key end

     0   :  { %v391_v0 = vmov 0.0   ;;  %vm392_vm0 = vmmov 0   ;;  %vm180_vm1 = vcmask 523264   ;;  %vm249_vm2 = vcmask 261120   ;;  %s493_s1 = inlined_call_operand.vmem [shape: bf16[128,64], index: 1, kind: input, shape index: {}]   ;;  %s494_s3 = inlined_call_operand.vmem [shape: bf16[64,32], index: 3, kind: input, shape index: {}]   ;;  %s495_s0 = inlined_call_operand.vmem [shape: bf16[8,128], index: 0, kind: input, shape index: {}]   ;;  %s496_s5 = inlined_call_operand.vmem [shape: bf16[32,3], index: 5, kind: input, shape index: {}]   ;;  %s497_s2 = inlined_call_operand.vmem [shape: f32[1,64], index: 2, kind: input, shape index: {}]   ;;  %s498_s4 = inlined_call_operand.vmem [shape: f32[1,32], index: 4, kind: input, shape index: {}]   ;;  %s499_s6 = inlined_call_operand.vmem [shape: f32[1,3], index: 6, kind: input, shape index: {}]   ;;  %s500_s7 = inlined_call_operand.vmem [shape: f32[8,3], index: 7, kind: output, shape index: {}]  }
   0x1   :  { %335 = vmatprep.subr.bf16.mxu0 %v391_v0  ;;  %v377_v1 = vld [vmem:[%s493_s1] sm:$0xff]   ;;  %351 = vmatprep.mubr.msk.bf16.mxu0 %vm392_vm0, %v391_v0  ;;  %v378_v2 = vld [vmem:[%s493_s1 + $0x8] sm:$0xff]   ;;  %v379_v3 = vld [vmem:[%s493_s1 + $0x10] sm:$0xff]   ;;  %vm293_vm3 = vcmask 23552  }
   0x2   :  { %355 = vmatprep.subr.bf16.mxu1 %v391_v0  ;;  %363 = vmatprep.mubr.msk.bf16.mxu1 %vm392_vm0, %v391_v0  ;;  %v385_v4 = vld [vmem:[%s494_s3] sm:$0xff]   ;;  %v380_v5 = vld [vmem:[%s493_s1 + $0x18] sm:$0xff]   ;;  %v386_v6 = vld [vmem:[%s494_s3 + $0x8] sm:$0xff]  }
   0x3   :  { %336 = vmatpush3.bf16.msra.mxu0 %v377_v1  ;;  %356 = vmatpush3.bf16.msra.mxu1 %v385_v4  ;;  %v381_v7 = vld [vmem:[%s493_s1 + $0x20] sm:$0xff]   ;;  %v382_v8 = vld [vmem:[%s493_s1 + $0x28] sm:$0xff]   ;;  %v383_v9 = vld [vmem:[%s493_s1 + $0x30] sm:$0xff]  }
   0x4   :  { %337 = vmatprep.subr.bf16.mxu0 %v391_v0  ;;  %357 = vmatprep.subr.bf16.mxu1 %v391_v0  ;;  %v384_v10 = vld [vmem:[%s493_s1 + $0x38] sm:$0xff]   ;;  %v27_v11 = vld [vmem:[%s495_s0] sm:$0xf]  ;;  %v387_v12 = vld [vmem:[%s494_s3 + $0x10] sm:$0xff]  }
   0x5   :  { %v388_v13 = vld [vmem:[%s494_s3 + $0x18] sm:$0xff]   ;;  %v299_v14 = vld [vmem:[%s497_s2] ss:$0 sm:$0xff]  ;;  %v390_v23 = vld [vmem:[%s496_s5 + $0x8] sm:$0xff]  }
   0x6   :  { %v389_v21 = vld [vmem:[%s496_s5] sm:$0xff]  }
   0x7   :  { %338 = vmatpush3.bf16.msra.mxu0 %v378_v2  ;;  %358 = vmatpush3.bf16.msra.mxu1 %v386_v6  ;;  %v308_v24 = vld [vmem:[%s498_s4] ss:$0 sm:$0xff] }
   0x8   :  { %339 = vmatprep.subr.bf16.mxu0 %v391_v0  ;;  %359 = vmatprep.subr.bf16.mxu1 %v391_v0  ;;  %v314_v32 = vld [vmem:[%s499_s6] ss:$0 sm:$0xff] }
   0xb   :  { %340 = vmatpush3.bf16.msra.mxu0 %v379_v3  ;;  %360 = vmatpush3.bf16.msra.mxu1 %v387_v12 }
   0xc   :  { %341 = vmatprep.subr.bf16.mxu0 %v391_v0  ;;  %361 = vmatprep.subr.bf16.mxu1 %v391_v0 }
   0xf   :  { %342 = vmatpush3.bf16.msra.mxu0 %v380_v5  ;;  %362 = vmatpush3.bf16.msra.mxu1 %v388_v13 }
  0x10   :  { %343 = vmatprep.subr.bf16.mxu0 %v391_v0  ;;  %367 = vmatprep.subr.bf16.mxu1 %v391_v0 }
  0x13   :  { %344 = vmatpush3.bf16.msra.mxu0 %v381_v7 }
  0x14   :  { %345 = vmatprep.subr.bf16.mxu0 %v391_v0 }
  0x17   :  { %346 = vmatpush3.bf16.msra.mxu0 %v382_v8 }
  0x18   :  { %347 = vmatprep.subr.bf16.mxu0 %v391_v0 }
  0x1b   :  { %348 = vmatpush3.bf16.msra.mxu0 %v383_v9 }
  0x1c   :  { %349 = vmatprep.subr.bf16.mxu0 %v391_v0 }
  0x1f   :  { %350 = vmatpush3.bf16.msra.mxu0 %v384_v10 }
  0x22   :  { %352 = vmatmul.mubr.bf16.vlgmr.msra.gmra.mrb[0].mxu0 %v27_v11 }
  0xf5   :  { %v133_v15 = vpop.f32.mrb[0].mxu0 }
  0xf6   :  { %v134_v16 = vadd.f32 %v299_v14, %v133_v15  ;;  %v353_v17 = vpop.f32.mrb[1].mxu0 }
  0xf7   :  { %v136_v18 = vpop.f32.mrb[2].mxu0 }
  0xf8   :  { %v139_v19 = vmax.f32 %v134_v16, 0.0  ;;  %v354_v20 = vpop.f32.mrb[3].mxu0 }
  0xfa   :  { %v140_v22 = vpack.c.bf16 %v139_v19, %v139_v19 }
  0xfc   :  { %364 = vmatmul.mubr.msk.bf16.vlgmr.msra.gmra.mrb[0].mxu1 %vm180_vm1, %v140_v22 }
  0xfd   :  { %368 = vmatpush3.bf16.msra.mxu1 %v389_v21  ;;  %371 = vmatprep.mubr.msk.bf16.mxu1 %vm392_vm0, %v391_v0 }
  0xfe   :  { %369 = vmatprep.subr.bf16.mxu1 %v391_v0 }
 0x101   :  { %370 = vmatpush3.bf16.msra.mxu1 %v390_v23 }
 0x1cf   :  { %v218_v25 = vpop.f32.mrb[0].mxu1 }
 0x1d0   :  { %v219_v26 = vadd.f32 %v308_v24, %v218_v25  ;;  %v365_v27 = vpop.f32.mrb[1].mxu1 }
 0x1d1   :  { %v221_v28 = vpop.f32.mrb[2].mxu1 }
 0x1d2   :  { %v224_v29 = vmax.f32 %v219_v26, 0.0  ;;  %v366_v30 = vpop.f32.mrb[3].mxu1 }
 0x1d4   :  { %v225_v31 = vpack.c.bf16 %v224_v29, %v224_v29 }
 0x1d6   :  { %372 = vmatmul.mubr.msk.bf16.vlgmr.msra.gmra.mrb[4].mxu1 %vm249_vm2, %v225_v31 }
 0x2a9   :  { %v287_v33 = vpop.f32.mrb[4].mxu1 }
 0x2aa   :  { %v288_v34 = vadd.f32 %v314_v32, %v287_v33  ;;  %v373_v35 = vpop.f32.mrb[5].mxu1 }
 0x2ab   :  { %v290_v36 = vpop.f32.mrb[6].mxu1 }
 0x2ac   :  { %294 = vst.msk [vmem:[%s500_s7] sm:$0xff] %vm293_vm3, %v288_v34  ;;  %v374_v37 = vpop.f32.mrb[7].mxu1 }

</bundles_post_ra>
